<compile_context>
chip_gen: v7x
topology: tpu7x:2x2x1
jax: 0.10.0
libtpu: 0.0.40
codegen_flags: <defaults>
</compile_context>

<pallas_src>
import functools

import jax
import jax.numpy as jnp
import numpy as np
from jax.experimental import pallas as pl
from jax.experimental.pallas import tpu as pltpu


def _zero_halo_rows(pad_ref):
    """Zero only the 1-row top/bottom halo of a padded scratch buffer."""
    rows, cols = pad_ref.shape
    z = jnp.zeros((1, cols), pad_ref.dtype)
    pad_ref[0:1, :] = z
    pad_ref[rows - 1:rows, :] = z


def _conv_relu_pool(pad_ref, wb_ref, Hl):
    """conv3x3(pad=1) -> 2x2/2 max-pool -> ReLU on lane-dense VMEM data.

    pad_ref: (Hl+2, Wl*Cin)  rows 0 / Hl+1 are the zero halo, rows 1..Hl hold
             the activation; horizontal padding is folded into wb.
    wb_ref:  (3, Wl*Cin, Wl*Cout) banded weights (one slab per ky); output
             columns ordered [even-w block | odd-w block].
    returns  (Hl//2, (Wl//2)*Cout) pooled + ReLU'd activation (lane-dense).
    """
    n_cols = wb_ref.shape[-1]
    nh = n_cols // 2
    # 3 accumulating MXU matmuls, one per vertical tap; LHS row windows are
    # contiguous sublane slices of the padded buffer (no im2col relayout).
    acc = jnp.dot(pad_ref[0:Hl, :], wb_ref[0],
                  preferred_element_type=jnp.float32)
    acc = acc + jnp.dot(pad_ref[1:Hl + 1, :], wb_ref[1],
                        preferred_element_type=jnp.float32)
    acc = acc + jnp.dot(pad_ref[2:Hl + 2, :], wb_ref[2],
                        preferred_element_type=jnp.float32)
    # 2x2 max-pool.  Columns are [even-w | odd-w], so the w-reduction is a max
    # of two contiguous lane halves; the h-reduction is a pairwise row max.
    pw = jnp.maximum(acc[:, :nh], acc[:, nh:])            # (Hl, (Wl//2)*Cout)
    ph = jnp.max(pw.reshape(Hl // 2, 2, nh), axis=1)      # (Hl//2, (Wl//2)*Cout)
    # ReLU after the pool (max is monotone -> identical to pool(relu(x))).
    return jnp.maximum(ph, 0.0)


def _encoder_kernel(x_ref, wb1_ref, wb2_ref, wb3_ref, o_ref,
                    pad1_ref, pad2_ref, pad3_ref, *, bblk, H):
    """Fused 3-layer encoder; all intermediates stay in VMEM (lane-dense)."""
    H2, H4 = H // 2, H // 4
    # Halo rows are never dirtied by the interior writes below, so zeroing
    # them once per grid step suffices (no program_id gating: scratch is
    # per-core under megacore sharding).
    _zero_halo_rows(pad1_ref)
    _zero_halo_rows(pad2_ref)
    _zero_halo_rows(pad3_ref)

    for b in range(bblk):               # static unroll over the batch block
        pad1_ref[1:H + 1, :] = x_ref[b]                     # (H,  W*3)
        y1 = _conv_relu_pool(pad1_ref, wb1_ref, H)          # (H/2, (W/2)*8)
        pad2_ref[1:H2 + 1, :] = y1
        y2 = _conv_relu_pool(pad2_ref, wb2_ref, H2)         # (H/4, (W/4)*16)
        pad3_ref[1:H4 + 1, :] = y2
        y3 = _conv_relu_pool(pad3_ref, wb3_ref, H4)         # (H/8, (W/8)*16)
        o_ref[b] = y3.astype(o_ref.dtype)


def _banded_weights(w, w_l):
    """(Cout, Cin, 3, 3) conv weight -> (3, w_l*Cin, w_l*Cout) banded matmuls.

    Wb[ky, win*Cin + cin, col(wout, cout)] = w[cout, cin, ky, win - wout + 1]
    for win in {wout-1, wout, wout+1} clipped to [0, w_l) -- the clipping IS
    the horizontal zero-padding.  Output columns are permuted so all even
    wout come first, then all odd wout, making the pool's w-reduction a max
    of two contiguous lane halves.
    """
    cout, cin = int(w.shape[0]), int(w.shape[1])
    wout_of_col_block = np.concatenate(
        [np.arange(0, w_l, 2), np.arange(1, w_l, 2)])      # column permutation
    slabs = []
    for ky in range(3):
        acc = jnp.zeros((w_l * cin, w_l * cout), jnp.float32)
        for kx in range(3):
            sel = np.zeros((w_l, w_l), np.float32)          # static 0/1 band
            for p in range(w_l):
                win = int(wout_of_col_block[p]) + kx - 1
                if 0 <= win < w_l:
                    sel[win, p] = 1.0
            acc = acc + jnp.kron(jnp.asarray(sel), w[:, :, ky, kx].T)
        slabs.append(acc)
    return jnp.stack(slabs)


@jax.jit
def encoder_forward(x_nchw, weights):
    """Matches Encoder.forward: 3 x (conv3x3 pad=1 no-bias -> ReLU -> maxpool2),
    fused into a single Pallas kernel with lane-dense VMEM intermediates."""
    N, C0, H, W = x_nchw.shape
    assert C0 == 3 and H % 8 == 0 and W % 8 == 0
    C1, C2, C3 = (int(w.shape[0]) for w in weights)         # 8, 16, 16
    H8, W8 = H // 8, W // 8

    # NCHW -> lane-dense (N, H, W*C) slab (wrapper glue, outside the kernel).
    x = jnp.transpose(x_nchw, (0, 2, 3, 1)).reshape(N, H, W * 3)

    # Banded weight matrices, one set per layer, built once per compile.
    wb1 = _banded_weights(weights[0], W)          # (3, W*3,      W*8)
    wb2 = _banded_weights(weights[1], W // 2)     # (3, (W/2)*8,  (W/2)*16)
    wb3 = _banded_weights(weights[2], W // 4)     # (3, (W/4)*16, (W/4)*16)

    # Batch block: biggest divisor of N that still leaves >=2 grid steps
    # (one per v7x TensorCore); bblk = 1 for the demo N=2.
    bblk = 1
    for cand in range(N // 2, 0, -1):
        if N % cand == 0:
            bblk = cand
            break
    grid = (N // bblk,)

    kernel = functools.partial(_encoder_kernel, bblk=bblk, H=H)

    out = pl.pallas_call(
        kernel,
        out_shape=jax.ShapeDtypeStruct((N, H8, W8 * C3), jnp.float32),
        grid=grid,
        in_specs=[
            pl.BlockSpec((bblk, H, W * 3), lambda n: (n, 0, 0)),
            pl.BlockSpec(wb1.shape, lambda n: (0, 0, 0)),
            pl.BlockSpec(wb2.shape, lambda n: (0, 0, 0)),
            pl.BlockSpec(wb3.shape, lambda n: (0, 0, 0)),
        ],
        out_specs=pl.BlockSpec((bblk, H8, W8 * C3), lambda n: (n, 0, 0)),
        scratch_shapes=[
            pltpu.VMEM((H + 2, W * 3), jnp.float32),               # layer-1 pad
            pltpu.VMEM((H // 2 + 2, (W // 2) * C1), jnp.float32),  # layer-2 pad
            pltpu.VMEM((H // 4 + 2, (W // 4) * C2), jnp.float32),  # layer-3 pad
        ],
        compiler_params=pltpu.CompilerParams(
            dimension_semantics=("parallel",)),
    )(x, wb1, wb2, wb3)

    # (N, H/8, (W/8)*C3) lane-dense slab -> NCHW (wrapper glue).
    return jnp.transpose(out.reshape(N, H8, W8, C3), (0, 3, 1, 2))


def ref_forward(x_nchw, weights):
    """Pure-JAX reference (NCHW, identical semantics to the PyTorch module)."""
    x = x_nchw
    for w in weights:
        y = jax.lax.conv_general_dilated(
            x, w, window_strides=(1, 1), padding=((1, 1), (1, 1)),
            dimension_numbers=("NCHW", "OIHW", "NCHW"),
        )
        y = jnp.maximum(y, 0.0)
        y = jax.lax.reduce_window(
            y, -jnp.inf, jax.lax.max,
            window_dimensions=(1, 1, 2, 2), window_strides=(1, 1, 2, 2),
            padding="VALID",
        )
        x = y
    return x


if __name__ == "__main__":
    # Deterministic inputs / parameters (synthetic, no checkpoint load).
    key = jax.random.PRNGKey(0)
    k_x, k1, k2, k3 = jax.random.split(key, 4)

    N, H, W = 2, 16, 16  # small shapes; H, W divisible by 8 (three 2x2 pools)
    x_nchw = jax.random.normal(k_x, (N, 3, H, W), dtype=jnp.float32)

    # Conv weight shapes from Encoder.__init__ (bias=False everywhere).
    w1 = 0.2 * jax.random.normal(k1, (8, 3, 3, 3), dtype=jnp.float32)
    w2 = 0.2 * jax.random.normal(k2, (16, 8, 3, 3), dtype=jnp.float32)
    w3 = 0.2 * jax.random.normal(k3, (16, 16, 3, 3), dtype=jnp.float32)
    weights = (w1, w2, w3)

    out = jax.block_until_ready(encoder_forward(x_nchw, weights))

    assert out.shape == (N, 16, H // 8, W // 8), out.shape
    ref = ref_forward(x_nchw, weights)
    if not bool(jnp.allclose(out, ref, rtol=1e-4, atol=1e-4)):
        raise AssertionError("Pallas encoder output does not match reference")

    print("KERNEL_OK")
</pallas_src>

<mosaic_0001>
module attributes {stable_mosaic.version = 11 : i64} {
  func.func @_encoder_kernel(%arg0: i32, %arg1: memref<1x16x48xf32, #tpu.memory_space<vmem>>, %arg2: memref<3x48x128xf32, #tpu.memory_space<vmem>>, %arg3: memref<3x64x128xf32, #tpu.memory_space<vmem>>, %arg4: memref<3x64x64xf32, #tpu.memory_space<vmem>>, %arg5: memref<1x2x32xf32, #tpu.memory_space<vmem>>, %arg6: memref<18x48xf32, #tpu.memory_space<vmem>>, %arg7: memref<10x64xf32, #tpu.memory_space<vmem>>, %arg8: memref<6x64xf32, #tpu.memory_space<vmem>>) attributes {dimension_semantics = [#tpu.dimension_semantics<parallel>], iteration_bounds = array<i64: 2>, scalar_prefetch = 0 : i64, scratch_operands = 3 : i64, tpu.core_type = #tpu.core_type<tc>, window_params = [{transform_indices = @transform_0, window_bounds = array<i64: 1, 16, 48>}, {pipeline_mode = #tpu.pipeline_mode<synchronous>, transform_indices = @transform_1, window_bounds = array<i64: 3, 48, 128>}, {pipeline_mode = #tpu.pipeline_mode<synchronous>, transform_indices = @transform_2, window_bounds = array<i64: 3, 64, 128>}, {pipeline_mode = #tpu.pipeline_mode<synchronous>, transform_indices = @transform_3, window_bounds = array<i64: 3, 64, 64>}, {transform_indices = @transform_4, window_bounds = array<i64: 1, 2, 32>}]} {
    %cst = arith.constant 0.000000e+00 : f32
    %0 = vector.broadcast %cst : f32 to vector<1x48xf32>
    %c0 = arith.constant 0 : index
    %c0_0 = arith.constant 0 : index
    %1 = vector.load %arg6[%c0, %c0_0] : memref<18x48xf32, #tpu.memory_space<vmem>>, vector<1x48xf32>
    tpu.vector_store %arg6[%c0, %c0_0], %0 {strides = array<i32>} : memref<18x48xf32, #tpu.memory_space<vmem>>, vector<1x48xf32>,
    %c17 = arith.constant 17 : index
    %c0_1 = arith.constant 0 : index
    %2 = vector.load %arg6[%c17, %c0_1] : memref<18x48xf32, #tpu.memory_space<vmem>>, vector<1x48xf32>
    tpu.vector_store %arg6[%c17, %c0_1], %0 {strides = array<i32>} : memref<18x48xf32, #tpu.memory_space<vmem>>, vector<1x48xf32>,
    %cst_2 = arith.constant 0.000000e+00 : f32
    %3 = vector.broadcast %cst_2 : f32 to vector<1x64xf32>
    %c0_3 = arith.constant 0 : index
    %c0_4 = arith.constant 0 : index
    %4 = vector.load %arg7[%c0_3, %c0_4] : memref<10x64xf32, #tpu.memory_space<vmem>>, vector<1x64xf32>
    tpu.vector_store %arg7[%c0_3, %c0_4], %3 {strides = array<i32>} : memref<10x64xf32, #tpu.memory_space<vmem>>, vector<1x64xf32>,
    %c9 = arith.constant 9 : index
    %c0_5 = arith.constant 0 : index
    %5 = vector.load %arg7[%c9, %c0_5] : memref<10x64xf32, #tpu.memory_space<vmem>>, vector<1x64xf32>
    tpu.vector_store %arg7[%c9, %c0_5], %3 {strides = array<i32>} : memref<10x64xf32, #tpu.memory_space<vmem>>, vector<1x64xf32>,
    %cst_6 = arith.constant 0.000000e+00 : f32
    %6 = vector.broadcast %cst_6 : f32 to vector<1x64xf32>
    %c0_7 = arith.constant 0 : index
    %c0_8 = arith.constant 0 : index
    %7 = vector.load %arg8[%c0_7, %c0_8] : memref<6x64xf32, #tpu.memory_space<vmem>>, vector<1x64xf32>
    tpu.vector_store %arg8[%c0_7, %c0_8], %6 {strides = array<i32>} : memref<6x64xf32, #tpu.memory_space<vmem>>, vector<1x64xf32>,
    %c5 = arith.constant 5 : index
    %c0_9 = arith.constant 0 : index
    %8 = vector.load %arg8[%c5, %c0_9] : memref<6x64xf32, #tpu.memory_space<vmem>>, vector<1x64xf32>
    tpu.vector_store %arg8[%c5, %c0_9], %6 {strides = array<i32>} : memref<6x64xf32, #tpu.memory_space<vmem>>, vector<1x64xf32>,
    %c0_10 = arith.constant 0 : index
    %c0_11 = arith.constant 0 : index
    %c0_12 = arith.constant 0 : index
    %9 = vector.load %arg1[%c0_10, %c0_11, %c0_12] : memref<1x16x48xf32, #tpu.memory_space<vmem>>, vector<1x16x48xf32>
    %10 = vector.shape_cast %9 : vector<1x16x48xf32> to vector<16x48xf32>
    %c1 = arith.constant 1 : index
    %c0_13 = arith.constant 0 : index
    %11 = vector.load %arg6[%c1, %c0_13] : memref<18x48xf32, #tpu.memory_space<vmem>>, vector<16x48xf32>
    tpu.vector_store %arg6[%c1, %c0_13], %10 {strides = array<i32>} : memref<18x48xf32, #tpu.memory_space<vmem>>, vector<16x48xf32>,
    %c0_14 = arith.constant 0 : index
    %c0_15 = arith.constant 0 : index
    %12 = vector.load %arg6[%c0_14, %c0_15] : memref<18x48xf32, #tpu.memory_space<vmem>>, vector<16x48xf32>
    %c0_16 = arith.constant 0 : index
    %c0_17 = arith.constant 0 : index
    %c0_18 = arith.constant 0 : index
    %13 = vector.load %arg2[%c0_16, %c0_17, %c0_18] : memref<3x48x128xf32, #tpu.memory_space<vmem>>, vector<1x48x128xf32>
    %14 = vector.shape_cast %13 : vector<1x48x128xf32> to vector<48x128xf32>
    %cst_19 = arith.constant dense<0.000000e+00> : vector<16x128xf32>
    %15 = tpu.matmul %12, %14, %cst_19 {dimension_numbers = #tpu.dot_dimension_numbers<[1], [0], [0], [1], [0, 0, 1, 1], [], []>} : vector<16x48xf32>, vector<48x128xf32>, vector<16x128xf32> -> vector<16x128xf32>
    %c1_20 = arith.constant 1 : index
    %c0_21 = arith.constant 0 : index
    %16 = vector.load %arg6[%c1_20, %c0_21] : memref<18x48xf32, #tpu.memory_space<vmem>>, vector<16x48xf32>
    %c1_22 = arith.constant 1 : index
    %c0_23 = arith.constant 0 : index
    %c0_24 = arith.constant 0 : index
    %17 = vector.load %arg2[%c1_22, %c0_23, %c0_24] : memref<3x48x128xf32, #tpu.memory_space<vmem>>, vector<1x48x128xf32>
    %18 = vector.shape_cast %17 : vector<1x48x128xf32> to vector<48x128xf32>
    %cst_25 = arith.constant dense<0.000000e+00> : vector<16x128xf32>
    %19 = tpu.matmul %16, %18, %cst_25 {dimension_numbers = #tpu.dot_dimension_numbers<[1], [0], [0], [1], [0, 0, 1, 1], [], []>} : vector<16x48xf32>, vector<48x128xf32>, vector<16x128xf32> -> vector<16x128xf32>
    %20 = arith.addf %15, %19 : vector<16x128xf32>
    %c2 = arith.constant 2 : index
    %c0_26 = arith.constant 0 : index
    %21 = vector.load %arg6[%c2, %c0_26] : memref<18x48xf32, #tpu.memory_space<vmem>>, vector<16x48xf32>
    %c2_27 = arith.constant 2 : index
    %c0_28 = arith.constant 0 : index
    %c0_29 = arith.constant 0 : index
    %22 = vector.load %arg2[%c2_27, %c0_28, %c0_29] : memref<3x48x128xf32, #tpu.memory_space<vmem>>, vector<1x48x128xf32>
    %23 = vector.shape_cast %22 : vector<1x48x128xf32> to vector<48x128xf32>
    %cst_30 = arith.constant dense<0.000000e+00> : vector<16x128xf32>
    %24 = tpu.matmul %21, %23, %cst_30 {dimension_numbers = #tpu.dot_dimension_numbers<[1], [0], [0], [1], [0, 0, 1, 1], [], []>} : vector<16x48xf32>, vector<48x128xf32>, vector<16x128xf32> -> vector<16x128xf32>
    %25 = arith.addf %20, %24 : vector<16x128xf32>
    %26 = vector.extract_strided_slice %25 {offsets = [0, 0], sizes = [16, 64], strides = [1, 1]} : vector<16x128xf32> to vector<16x64xf32>
    %27 = vector.extract_strided_slice %25 {offsets = [0, 64], sizes = [16, 64], strides = [1, 1]} : vector<16x128xf32> to vector<16x64xf32>
    %28 = arith.maximumf %26, %27 : vector<16x64xf32>
    %29 = vector.shape_cast %28 : vector<16x64xf32> to vector<8x2x64xf32>
    %cst_31 = arith.constant dense<0xFF800000> : vector<8x64xf32>
    %30 = vector.multi_reduction <maximumf>, %29, %cst_31 [1] : vector<8x2x64xf32> to vector<8x64xf32>
    %cst_32 = arith.constant 0.000000e+00 : f32
    %31 = vector.broadcast %cst_32 : f32 to vector<8x64xf32>
    %32 = arith.maximumf %30, %31 : vector<8x64xf32>
    %c1_33 = arith.constant 1 : index
    %c0_34 = arith.constant 0 : index
    %33 = vector.load %arg7[%c1_33, %c0_34] : memref<10x64xf32, #tpu.memory_space<vmem>>, vector<8x64xf32>
    tpu.vector_store %arg7[%c1_33, %c0_34], %32 {strides = array<i32>} : memref<10x64xf32, #tpu.memory_space<vmem>>, vector<8x64xf32>,
    %c0_35 = arith.constant 0 : index
    %c0_36 = arith.constant 0 : index
    %34 = vector.load %arg7[%c0_35, %c0_36] : memref<10x64xf32, #tpu.memory_space<vmem>>, vector<8x64xf32>
    %c0_37 = arith.constant 0 : index
    %c0_38 = arith.constant 0 : index
    %c0_39 = arith.constant 0 : index
    %35 = vector.load %arg3[%c0_37, %c0_38, %c0_39] : memref<3x64x128xf32, #tpu.memory_space<vmem>>, vector<1x64x128xf32>
    %36 = vector.shape_cast %35 : vector<1x64x128xf32> to vector<64x128xf32>
    %cst_40 = arith.constant dense<0.000000e+00> : vector<8x128xf32>
    %37 = tpu.matmul %34, %36, %cst_40 {dimension_numbers = #tpu.dot_dimension_numbers<[1], [0], [0], [1], [0, 0, 1, 1], [], []>} : vector<8x64xf32>, vector<64x128xf32>, vector<8x128xf32> -> vector<8x128xf32>
    %c1_41 = arith.constant 1 : index
    %c0_42 = arith.constant 0 : index
    %38 = vector.load %arg7[%c1_41, %c0_42] : memref<10x64xf32, #tpu.memory_space<vmem>>, vector<8x64xf32>
    %c1_43 = arith.constant 1 : index
    %c0_44 = arith.constant 0 : index
    %c0_45 = arith.constant 0 : index
    %39 = vector.load %arg3[%c1_43, %c0_44, %c0_45] : memref<3x64x128xf32, #tpu.memory_space<vmem>>, vector<1x64x128xf32>
    %40 = vector.shape_cast %39 : vector<1x64x128xf32> to vector<64x128xf32>
    %cst_46 = arith.constant dense<0.000000e+00> : vector<8x128xf32>
    %41 = tpu.matmul %38, %40, %cst_46 {dimension_numbers = #tpu.dot_dimension_numbers<[1], [0], [0], [1], [0, 0, 1, 1], [], []>} : vector<8x64xf32>, vector<64x128xf32>, vector<8x128xf32> -> vector<8x128xf32>
    %42 = arith.addf %37, %41 : vector<8x128xf32>
    %c2_47 = arith.constant 2 : index
    %c0_48 = arith.constant 0 : index
    %43 = vector.load %arg7[%c2_47, %c0_48] : memref<10x64xf32, #tpu.memory_space<vmem>>, vector<8x64xf32>
    %c2_49 = arith.constant 2 : index
    %c0_50 = arith.constant 0 : index
    %c0_51 = arith.constant 0 : index
    %44 = vector.load %arg3[%c2_49, %c0_50, %c0_51] : memref<3x64x128xf32, #tpu.memory_space<vmem>>, vector<1x64x128xf32>
    %45 = vector.shape_cast %44 : vector<1x64x128xf32> to vector<64x128xf32>
    %cst_52 = arith.constant dense<0.000000e+00> : vector<8x128xf32>
    %46 = tpu.matmul %43, %45, %cst_52 {dimension_numbers = #tpu.dot_dimension_numbers<[1], [0], [0], [1], [0, 0, 1, 1], [], []>} : vector<8x64xf32>, vector<64x128xf32>, vector<8x128xf32> -> vector<8x128xf32>
    %47 = arith.addf %42, %46 : vector<8x128xf32>
    %48 = vector.extract_strided_slice %47 {offsets = [0, 0], sizes = [8, 64], strides = [1, 1]} : vector<8x128xf32> to vector<8x64xf32>
    %49 = vector.extract_strided_slice %47 {offsets = [0, 64], sizes = [8, 64], strides = [1, 1]} : vector<8x128xf32> to vector<8x64xf32>
    %50 = arith.maximumf %48, %49 : vector<8x64xf32>
    %51 = vector.shape_cast %50 : vector<8x64xf32> to vector<4x2x64xf32>
    %cst_53 = arith.constant dense<0xFF800000> : vector<4x64xf32>
    %52 = vector.multi_reduction <maximumf>, %51, %cst_53 [1] : vector<4x2x64xf32> to vector<4x64xf32>
    %cst_54 = arith.constant 0.000000e+00 : f32
    %53 = vector.broadcast %cst_54 : f32 to vector<4x64xf32>
    %54 = arith.maximumf %52, %53 : vector<4x64xf32>
    %c1_55 = arith.constant 1 : index
    %c0_56 = arith.constant 0 : index
    %55 = vector.load %arg8[%c1_55, %c0_56] : memref<6x64xf32, #tpu.memory_space<vmem>>, vector<4x64xf32>
    tpu.vector_store %arg8[%c1_55, %c0_56], %54 {strides = array<i32>} : memref<6x64xf32, #tpu.memory_space<vmem>>, vector<4x64xf32>,
    %c0_57 = arith.constant 0 : index
    %c0_58 = arith.constant 0 : index
    %56 = vector.load %arg8[%c0_57, %c0_58] : memref<6x64xf32, #tpu.memory_space<vmem>>, vector<4x64xf32>
    %c0_59 = arith.constant 0 : index
    %c0_60 = arith.constant 0 : index
    %c0_61 = arith.constant 0 : index
    %57 = vector.load %arg4[%c0_59, %c0_60, %c0_61] : memref<3x64x64xf32, #tpu.memory_space<vmem>>, vector<1x64x64xf32>
    %58 = vector.shape_cast %57 : vector<1x64x64xf32> to vector<64x64xf32>
    %cst_62 = arith.constant dense<0.000000e+00> : vector<4x64xf32>
    %59 = tpu.matmul %56, %58, %cst_62 {dimension_numbers = #tpu.dot_dimension_numbers<[1], [0], [0], [1], [0, 0, 1, 1], [], []>} : vector<4x64xf32>, vector<64x64xf32>, vector<4x64xf32> -> vector<4x64xf32>
    %c1_63 = arith.constant 1 : index
    %c0_64 = arith.constant 0 : index
    %60 = vector.load %arg8[%c1_63, %c0_64] : memref<6x64xf32, #tpu.memory_space<vmem>>, vector<4x64xf32>
    %c1_65 = arith.constant 1 : index
    %c0_66 = arith.constant 0 : index
    %c0_67 = arith.constant 0 : index
    %61 = vector.load %arg4[%c1_65, %c0_66, %c0_67] : memref<3x64x64xf32, #tpu.memory_space<vmem>>, vector<1x64x64xf32>
    %62 = vector.shape_cast %61 : vector<1x64x64xf32> to vector<64x64xf32>
    %cst_68 = arith.constant dense<0.000000e+00> : vector<4x64xf32>
    %63 = tpu.matmul %60, %62, %cst_68 {dimension_numbers = #tpu.dot_dimension_numbers<[1], [0], [0], [1], [0, 0, 1, 1], [], []>} : vector<4x64xf32>, vector<64x64xf32>, vector<4x64xf32> -> vector<4x64xf32>
    %64 = arith.addf %59, %63 : vector<4x64xf32>
    %c2_69 = arith.constant 2 : index
    %c0_70 = arith.constant 0 : index
    %65 = vector.load %arg8[%c2_69, %c0_70] : memref<6x64xf32, #tpu.memory_space<vmem>>, vector<4x64xf32>
    %c2_71 = arith.constant 2 : index
    %c0_72 = arith.constant 0 : index
    %c0_73 = arith.constant 0 : index
    %66 = vector.load %arg4[%c2_71, %c0_72, %c0_73] : memref<3x64x64xf32, #tpu.memory_space<vmem>>, vector<1x64x64xf32>
    %67 = vector.shape_cast %66 : vector<1x64x64xf32> to vector<64x64xf32>
    %cst_74 = arith.constant dense<0.000000e+00> : vector<4x64xf32>
    %68 = tpu.matmul %65, %67, %cst_74 {dimension_numbers = #tpu.dot_dimension_numbers<[1], [0], [0], [1], [0, 0, 1, 1], [], []>} : vector<4x64xf32>, vector<64x64xf32>, vector<4x64xf32> -> vector<4x64xf32>
    %69 = arith.addf %64, %68 : vector<4x64xf32>
    %70 = vector.extract_strided_slice %69 {offsets = [0, 0], sizes = [4, 32], strides = [1, 1]} : vector<4x64xf32> to vector<4x32xf32>
    %71 = vector.extract_strided_slice %69 {offsets = [0, 32], sizes = [4, 32], strides = [1, 1]} : vector<4x64xf32> to vector<4x32xf32>
    %72 = arith.maximumf %70, %71 : vector<4x32xf32>
    %73 = vector.shape_cast %72 : vector<4x32xf32> to vector<2x2x32xf32>
    %cst_75 = arith.constant dense<0xFF800000> : vector<2x32xf32>
    %74 = vector.multi_reduction <maximumf>, %73, %cst_75 [1] : vector<2x2x32xf32> to vector<2x32xf32>
    %cst_76 = arith.constant 0.000000e+00 : f32
    %75 = vector.broadcast %cst_76 : f32 to vector<2x32xf32>
    %76 = arith.maximumf %74, %75 : vector<2x32xf32>
    %c0_77 = arith.constant 0 : index
    %c0_78 = arith.constant 0 : index
    %c0_79 = arith.constant 0 : index
    %77 = vector.load %arg5[%c0_77, %c0_78, %c0_79] : memref<1x2x32xf32, #tpu.memory_space<vmem>>, vector<1x2x32xf32>
    %78 = vector.shape_cast %77 : vector<1x2x32xf32> to vector<2x32xf32>
    %79 = vector.shape_cast %76 : vector<2x32xf32> to vector<1x2x32xf32>
    tpu.vector_store %arg5[%c0_77, %c0_78, %c0_79], %79 {strides = array<i32>} : memref<1x2x32xf32, #tpu.memory_space<vmem>>, vector<1x2x32xf32>,
    return
  }
  func.func @transform_0(%arg0: i32) -> (i32, i32, i32) {
    %c0_i32 = arith.constant 0 : i32
    %c0_i32_0 = arith.constant 0 : i32
    %c0_i32_1 = arith.constant 0 : i32
    return %arg0, %c0_i32, %c0_i32_0 : i32, i32, i32
  }
  func.func @transform_1(%arg0: i32) -> (i32, i32, i32) {
    %c0_i32 = arith.constant 0 : i32
    %c0_i32_0 = arith.constant 0 : i32
    %c0_i32_1 = arith.constant 0 : i32
    %c0_i32_2 = arith.constant 0 : i32
    return %c0_i32, %c0_i32_0, %c0_i32_1 : i32, i32, i32
  }
  func.func @transform_2(%arg0: i32) -> (i32, i32, i32) {
    %c0_i32 = arith.constant 0 : i32
    %c0_i32_0 = arith.constant 0 : i32
    %c0_i32_1 = arith.constant 0 : i32
    %c0_i32_2 = arith.constant 0 : i32
    return %c0_i32, %c0_i32_0, %c0_i32_1 : i32, i32, i32
  }
  func.func @transform_3(%arg0: i32) -> (i32, i32, i32) {
    %c0_i32 = arith.constant 0 : i32
    %c0_i32_0 = arith.constant 0 : i32
    %c0_i32_1 = arith.constant 0 : i32
    %c0_i32_2 = arith.constant 0 : i32
    return %c0_i32, %c0_i32_0, %c0_i32_1 : i32, i32, i32
  }
  func.func @transform_4(%arg0: i32) -> (i32, i32, i32) {
    %c0_i32 = arith.constant 0 : i32
    %c0_i32_0 = arith.constant 0 : i32
    %c0_i32_1 = arith.constant 0 : i32
    return %arg0, %c0_i32, %c0_i32_0 : i32, i32, i32
  }
}

</mosaic_0001>

<bundles_post_ra>
// kernel: encoder_forward.1
= control target key start
LH: loop header
LB: loop body
LE: loop exit
PB: predicated region body
PF: predicated region fallthrough
CT: control target
= control target key end

     0   :  { %s1758_s15 = smov 0   ;;  %s2068_s0 = inlined_call_operand.vmem [shape: f32[2,16,48], index: 0, kind: input, shape index: {}]   ;;  %s2069_s1 = inlined_call_operand.vmem [shape: f32[3,48,128], index: 1, kind: input, shape index: {}]   ;;  %s2070_s2 = inlined_call_operand.vmem [shape: f32[3,64,128], index: 2, kind: input, shape index: {}]   ;;  %s2071_s3 = inlined_call_operand.vmem [shape: f32[3,64,64], index: 3, kind: input, shape index: {}]   ;;  %s2072_s4 = inlined_call_operand.vmem [shape: f32[2,2,32], index: 4, kind: output, shape index: {}]  }
   0x1 LB: > { %s1282_s16 = sadd.s32 4294967295, %s1725_s15   ;;  %p1286_p0 = scmp.ge.s32.totalorder %s1725_s15, 1  ;;  %s1725_s15 = sphi %s1758_s15, %s14_s15  }
   0x2   : > { %p162_p1 = scmp.lt.s32.totalorder %s1725_s15, 3 }
   0x4   : > { %p163_p2 = pnand %p1286_p0, %p162_p1 }
   0x5   : > { %v1290_v0 = vld [vmem:[%s2069_s1 + $0x30] sm:$0xff] (!%p163_p2)  ;;  %v1291_v1 = vld [vmem:[%s2069_s1 + $0x38] sm:$0xff] (!%p163_p2)  ;;  %v1292_v2 = vld [vmem:[%s2069_s1 + $0x40] sm:$0xff] (!%p163_p2)  ;;  %p187_p3 = scmp.lt.s32.totalorder (!%p163_p2), %s1282_s16, 1  ;;  %vm196_vm0 = vcmask (!%p163_p2), 385024   ;;  %v1727_v8 = vmov (!%p163_p2), 0.0   ;;  %v496_v53 = vlaneseq (!%p163_p2) }
   0x6   : > { %166 = sbr.rel (%p163_p2) target bundleno = 1177 (0x499), region = 36  ;;  %v1586_v3 = vpack.c.bf16 (!%p163_p2), %v1291_v1, %v1290_v0  ;;  %v1293_v4 = vld [vmem:[%s2069_s1 + $0x48] sm:$0xff] (!%p163_p2)  ;;  %v1294_v6 = vld [vmem:[%s2069_s1 + $0x50] sm:$0xff] (!%p163_p2)  ;;  %v1295_v7 = vld [vmem:[%s2069_s1 + $0x58] sm:$0xff] (!%p163_p2)  ;;  %197 = vst.msk [vmem:[#allocation2] sm:$0x1] (!%p163_p2), %vm196_vm0, %v1727_v8 }
   0x7   : > { %v1590_v5 = vpack.c.bf16 (!%p163_p2), %v1293_v4, %v1292_v2  ;;  %198 = vst.msk [vmem:[#allocation2 + $0x11] sm:$0x1] (!%p163_p2), %vm196_vm0, %v1727_v8  ;;  %vm206_vm1 = vcmask (!%p163_p2), 392192   ;;  %v1594_v9 = vpack.c.bf16 (!%p163_p2), %v1295_v7, %v1294_v6  ;;  %v211_v10 = vld [vmem:[%s2069_s1] sm:$0xff] (!%p163_p2)  ;;  %v212_v13 = vld [vmem:[%s2069_s1 + $0x8] sm:$0xff] (!%p163_p2)  ;;  %v213_v15 = vld [vmem:[%s2069_s1 + $0x10] sm:$0xff] (!%p163_p2) }
   0x8   : > { %1587 = vmatprep.subr.bf16.mxu0 (!%p163_p2), %v1586_v3  ;;  %v1598_v14 = vpack.c.bf16 (!%p163_p2), %v212_v13, %v211_v10  ;;  %v214_v16 = vld [vmem:[%s2069_s1 + $0x18] sm:$0xff] (!%p163_p2)  ;;  %v215_v21 = vld [vmem:[%s2069_s1 + $0x20] sm:$0xff] (!%p163_p2)  ;;  %v216_v22 = vld [vmem:[%s2069_s1 + $0x28] sm:$0xff] (!%p163_p2)  ;;  %s1728_s7 = smov (!%p163_p2), 64   ;;  %v1729_v41 = vmov (!%p163_p2), 0.0|0.0   ;;  %vm1730_vm2 = vmmov (!%p163_p2), 0  }
   0x9   : > { %1589 = vmatpush3.bf16.msra.mxu0 (!%p163_p2), %v1586_v3  ;;  %v1602_v19 = vpack.c.bf16 (!%p163_p2), %v214_v16, %v213_v15  ;;  %v1606_v23 = vpack.c.bf16 (!%p163_p2), %v216_v22, %v215_v21  ;;  %v1300_v24 = vld [vmem:[%s2069_s1 + $0x60] sm:$0xff] (!%p163_p2)  ;;  %v1301_v25 = vld [vmem:[%s2069_s1 + $0x68] sm:$0xff] (!%p163_p2)  ;;  %v1302_v27 = vld [vmem:[%s2069_s1 + $0x70] sm:$0xff] (!%p163_p2)  ;;  %1622 = vmatprep.subr.bf16.mxu1 (!%p163_p2), %v1729_v41  ;;  %vm199_vm3 = vcmask (!%p163_p2), 516096   ;;  %v1731_v51 = vmov (!%p163_p2), 1983009808  }
   0xa   : > { %1591 = vmatprep.subr.bf16.mxu0 (!%p163_p2), %v1590_v5  ;;  %v1610_v26 = vpack.c.bf16 (!%p163_p2), %v1301_v25, %v1300_v24  ;;  %v1303_v28 = vld [vmem:[%s2069_s1 + $0x78] sm:$0xff] (!%p163_p2)  ;;  %v1304_v32 = vld [vmem:[%s2069_s1 + $0x80] sm:$0xff] (!%p163_p2)  ;;  %v1305_v33 = vld [vmem:[%s2069_s1 + $0x88] sm:$0xff] (!%p163_p2)  ;;  %1488 = vmatprep.mubr.msk.f32.mxu1 (!%p163_p2), %vm1730_vm2, %v1727_v8  ;;  %200 = vst.msk [vmem:[#allocation3] sm:$0x1] (!%p163_p2), %vm199_vm3, %v1727_v8  ;;  %v494_v52 = vunpack.c.l.s4 (!%p163_p2), %v1731_v51  ;;  %v497_v55 = vshrl.u32 (!%p163_p2), %v496_v53, 7 }
   0xb   : > { %v1614_v30 = vpack.c.bf16 (!%p163_p2), %v1303_v28, %v1302_v27  ;;  %v1618_v34 = vpack.c.bf16 (!%p163_p2), %v1305_v33, %v1304_v32  ;;  %v1308_v38 = vld [vmem:[%s2070_s2 + $0x40] sm:$0xff] (!%p163_p2)  ;;  %v1309_v39 = vld [vmem:[%s2070_s2 + $0x48] sm:$0xff] (!%p163_p2)  ;;  %v1310_v42 = vld [vmem:[%s2070_s2 + $0x50] sm:$0xff] (!%p163_p2)  ;;  %201 = vst.msk [vmem:[#allocation3 + $0x9] sm:$0x1] (!%p163_p2), %vm199_vm3, %v1727_v8  ;;  %vm534_vm4 = vcmask (!%p163_p2), 517120  }
   0xc   : > { %v1623_v40 = vpack.c.bf16 (!%p163_p2), %v1309_v39, %v1308_v38  ;;  %v1311_v43 = vld [vmem:[%s2070_s2 + $0x58] sm:$0xff] (!%p163_p2)  ;;  %v1312_v45 = vld [vmem:[%s2070_s2 + $0x60] sm:$0xff] (!%p163_p2)  ;;  %v1313_v46 = vld [vmem:[%s2070_s2 + $0x68] sm:$0xff] (!%p163_p2)  ;;  %202 = vst.msk [vmem:[#allocation4] sm:$0x1] (!%p163_p2), %vm199_vm3, %v1727_v8  ;;  %v495_v54 = vunpack.c.0.s8 (!%p163_p2), %v494_v52  ;;  %vm607_vm5 = vcmask (!%p163_p2), 1041409  }
   0xd   : > { %s2074_s16 = smov (!%p187_p3, %s1282_s16), 1  ;;  %1593 = vmatpush3.bf16.msra.mxu0 %v1590_v5  ;;  %v1626_v44 = vpack.c.bf16 %v1311_v43, %v1310_v42  ;;  %v1629_v47 = vpack.c.bf16 %v1313_v46, %v1312_v45  ;;  %v1314_v48 = vld [vmem:[%s2070_s2 + $0x70] sm:$0xff]  ;;  %v1315_v49 = vld [vmem:[%s2070_s2 + $0x78] sm:$0xff]  ;;  %203 = vst.msk [vmem:[#allocation4 + $0x5] sm:$0x1] %vm199_vm3, %v1727_v8  ;;  %vm609_vm6 = vcmask 1042434  }
   0xe   : > { %s1348_s29 = sshll.u32 %s2074_s16, 4  ;;  %1595 = vmatprep.subr.bf16.mxu0 %v1594_v9  ;;  %1624 = vmatpush3.bf16.msra.mxu1 %v1623_v40  ;;  %v1632_v50 = vpack.c.bf16 %v1315_v49, %v1314_v48  ;;  %v1876_v56 = vsub.s32 %v495_v54, %v497_v55  ;;  %vm611_vm7 = vcmask 1043459   ;;  %vm613_vm8 = vcmask 1044484   ;;  %s1732_s10 = smov 96  }
   0xf   : > { %s191_s6 = scalar_lea.vmem %s2068_s0, %s1348_s29  ;;  %1625 = vmatprep.subr.bf16.mxu1 %v1729_v41  ;;  %vm615_vm9 = vcmask 1045509   ;;  %vm617_vm10 = vcmask 1046534   ;;  %vm619_vm11 = vcmask 1047559   ;;  %vm622_vm12 = vcmask 523264   ;;  %s1289_s11 = sshll.u32 %s2074_s16, 1 }
  0x10   : > { %v204_v11 = vld [vmem:[%s191_s6] sm:$0xff]  ;;  %v205_v12 = vld [vmem:[%s191_s6 + $0x8] sm:$0xff]  ;;  %vm940_vm13 = vcmask 519168   ;;  %vm1207_vm14 = vcmask 254976   ;;  %s195_s14 = scalar_lea.vmem %s2072_s4, %s1289_s11 }
  0x11   : > { %207 = vst.msk [vmem:[#allocation2 + $0x1] sm:$0xff] %vm206_vm1, %v204_v11  ;;  %208 = vst.msk [vmem:[#allocation2 + $0x9] sm:$0xff] %vm206_vm1, %v205_v12  ;;  %1597 = vmatpush3.bf16.msra.mxu0 %v1594_v9 }
  0x12   : > { %1599 = vmatprep.subr.bf16.mxu0 %v1598_v14  ;;  %1627 = vmatpush3.bf16.msra.mxu1 %v1626_v44 }
  0x13   : > { %1628 = vmatprep.subr.bf16.mxu1 %v1729_v41 }
  0x16   : > { %1630 = vmatpush3.bf16.msra.mxu1 %v1629_v47 }
  0x17   : > { %1631 = vmatprep.subr.bf16.mxu1 %v1729_v41 }
  0x18   : > { %v217_v17 = vld [vmem:[#allocation2 + $0x1] sm:$0xff]  ;;  %v218_v18 = vld [vmem:[#allocation2 + $0x9] sm:$0xff] }
  0x19   : > { %v209_v20 = vld [vmem:[#allocation2] sm:$0xff]  ;;  %1439 = vmatprep.mubr.msk.f32.mxu0 %vm206_vm1, %v217_v17  ;;  %v210_v29 = vld [vmem:[#allocation2 + $0x8] sm:$0xff] }
  0x1a   : > { %1440 = vmatmul.mubr.msk.f32.vlgmr.msra.gmra.mrb[0].mxu0 %vm206_vm1, %v218_v18  ;;  %v388_v31 = vld [vmem:[#allocation2 + $0x2] sm:$0xff]  ;;  %v389_v35 = vld [vmem:[#allocation2 + $0xa] sm:$0xff]  ;;  %1633 = vmatpush3.bf16.msra.mxu1 %v1632_v50 }
  0x1b   : > { %1601 = vmatpush3.bf16.msra.mxu0 %v1598_v14  ;;  %1454 = vmatprep.mubr.msk.f32.mxu0 %vm206_vm1, %v209_v20 }
  0x1c   : > { %1603 = vmatprep.subr.bf16.mxu0 %v1602_v19  ;;  %1634 = vmatprep.subr.bf16.mxu1 %v1729_v41 }
  0x1f   : > { %1605 = vmatpush3.bf16.msra.mxu0 %v1602_v19 }
  0x20   : > { %1607 = vmatprep.subr.bf16.mxu0 %v1606_v23 }
  0x23   : > { %1609 = vmatpush3.bf16.msra.mxu0 %v1606_v23 }
  0x24   : > { %1611 = vmatprep.subr.bf16.mxu0 %v1610_v26 }
  0x26   : > { %1455 = vmatmul.mubr.msk.f32.vlgmr.msra.gmra.mrb[0].mxu0 %vm206_vm1, %v210_v29 }
  0x27   : > { %1613 = vmatpush3.bf16.msra.mxu0 %v1610_v26  ;;  %1469 = vmatprep.mubr.msk.f32.mxu0 %vm206_vm1, %v388_v31 }
  0x28   : > { %1615 = vmatprep.subr.bf16.mxu0 %v1614_v30 }
  0x2b   : > { %1617 = vmatpush3.bf16.msra.mxu0 %v1614_v30 }
  0x2c   : > { %1619 = vmatprep.subr.bf16.mxu0 %v1618_v34 }
  0x2f   : > { %1621 = vmatpush3.bf16.msra.mxu0 %v1618_v34 }
  0x30   : > { %1670 = vmatprep.subr.bf16.mxu0 %v1729_v41 }
  0x32   : > { %1470 = vmatmul.mubr.msk.f32.vlgmr.msra.gmra.mrb[0].mxu0 %vm206_vm1, %v389_v35 }
  0x33   : > { %1564 = vmatprep.mubr.msk.f32.mxu0 %vm1730_vm2, %v1727_v8 }
 0x105   : > { %v1471_v36 = vpop.f32.mrb[0].mxu0 }
 0x106   : > { %v469_v37 = vpop.f32.mrb[1].mxu0 }
 0x107   : > { %482 = vrot.lane.b32.xlu0 %v469_v37, %s1728_s7 }
 0x10b   : > { %484 = vrot.lane.b32.xlu0 %v1471_v36, %s1728_s7 }
 0x179   : > { %v483_v57 = vpop.permute.xlu0 %482 }
 0x17a   : > { %v488_v58 = vmax.f32 %v469_v37, %v483_v57 }
 0x17c   : > { %v492_v59 = vcombine.high %v488_v58, %v488_v58  ;;  %v499_v60 = vrot.slane %v488_v58, %v1876_v56 }
 0x17d   : > { %v485_v61 = vpop.permute.xlu0 %484 }
 0x17e   : > { %v506_v62 = vrot.slane %v492_v59, %v1876_v56  ;;  %v507_v63 = vcombine.high %v499_v60, %v499_v60  ;;  %v535_v0 = vsel %vm534_vm4, %v499_v60, -inf  ;;  %v489_v1 = vmax.f32 %v1471_v36, %v485_v61 }
 0x17f   : > { %v536_v2 = vrot.slane %v535_v0, 4 }
 0x180   : > { %v508_v3 = vcombine.high %v506_v62, %v506_v62  ;;  %v542_v4 = vsel %vm534_vm4, %v507_v63, -inf  ;;  %v549_v5 = vsel %vm534_vm4, %v506_v62, -inf  ;;  %v509_v6 = vcombine.high %v489_v1, %v489_v1 }
 0x181   : > { %v537_v7 = vmax.f32 %v535_v0, %v536_v2  ;;  %v543_v9 = vrot.slane %v542_v4, 4  ;;  %v550_v10 = vrot.slane %v549_v5, 4  ;;  %v516_v11 = vrot.slane %v489_v1, %v1876_v56 }
 0x182   : > { %v556_v12 = vsel %vm534_vm4, %v508_v3, -inf  ;;  %v523_v13 = vrot.slane %v509_v6, %v1876_v56 }
 0x183   : > { %v538_v14 = vrot.slane %v537_v7, 2  ;;  %v544_v15 = vmax.f32 %v542_v4, %v543_v9  ;;  %v551_v16 = vmax.f32 %v549_v5, %v550_v10  ;;  %v557_v17 = vrot.slane %v556_v12, 4 }
 0x184   : > { %v524_v18 = vcombine.high %v516_v11, %v516_v11  ;;  %v525_v19 = vcombine.high %v523_v13, %v523_v13  ;;  %v563_v20 = vsel %vm534_vm4, %v516_v11, -inf  ;;  %v577_v21 = vsel %vm534_vm4, %v523_v13, -inf }
 0x185   : > { %v539_v22 = vmax.f32 %v537_v7, %v538_v14  ;;  %v545_v23 = vrot.slane %v544_v15, 2  ;;  %v552_v24 = vrot.slane %v551_v16, 2  ;;  %v558_v25 = vmax.f32 %v556_v12, %v557_v17 }
 0x186   : > { %v564_v26 = vrot.slane %v563_v20, 4  ;;  %v570_v27 = vsel %vm534_vm4, %v524_v18, -inf  ;;  %v578_v28 = vrot.slane %v577_v21, 4  ;;  %v584_v29 = vsel %vm534_vm4, %v525_v19, -inf  ;;  %v625_v18 = vld [vmem:[%s2070_s2] sm:$0xff]  ;;  %v626_v19 = vld [vmem:[%s2070_s2 + $0x8] sm:$0xff] }
 0x187   : > { %v540_v30 = vrot.slane %v539_v22, 1  ;;  %v546_v31 = vmax.f32 %v544_v15, %v545_v23  ;;  %v553_v32 = vmax.f32 %v551_v16, %v552_v24  ;;  %v559_v33 = vrot.slane %v558_v25, 2 }
 0x188   : > { %v565_v34 = vmax.f32 %v563_v20, %v564_v26  ;;  %v571_v35 = vrot.slane %v570_v27, 4  ;;  %v579_v36 = vmax.f32 %v577_v21, %v578_v28  ;;  %v585_v37 = vrot.slane %v584_v29, 4  ;;  %v627_v21 = vld [vmem:[%s2070_s2 + $0x10] sm:$0xff]  ;;  %v630_v26 = vld [vmem:[%s2070_s2 + $0x28] sm:$0xff] }
 0x189   : > { %v541_v38 = vmax.f32 %v539_v22, %v540_v30  ;;  %v547_v39 = vrot.slane %v546_v31, 1  ;;  %v554_v40 = vrot.slane %v553_v32, 1  ;;  %v560_v42 = vmax.f32 %v558_v25, %v559_v33  ;;  %v628_v22 = vld [vmem:[%s2070_s2 + $0x18] sm:$0xff]  ;;  %v629_v25 = vld [vmem:[%s2070_s2 + $0x20] sm:$0xff]  ;;  %v631_v28 = vld [vmem:[%s2070_s2 + $0x30] sm:$0xff] }
 0x18a   : > { %v566_v43 = vrot.slane %v565_v34, 2  ;;  %v572_v44 = vmax.f32 %v570_v27, %v571_v35  ;;  %v580_v45 = vrot.slane %v579_v36, 2  ;;  %v586_v46 = vmax.f32 %v584_v29, %v585_v37  ;;  %v632_v29 = vld [vmem:[%s2070_s2 + $0x38] sm:$0xff] }
 0x18b   : > { %v548_v47 = vmax.f32 %v546_v31, %v547_v39  ;;  %v555_v48 = vmax.f32 %v553_v32, %v554_v40  ;;  %v561_v49 = vrot.slane %v560_v42, 1  ;;  %v591_v55 = vmax.f32 %v541_v38, 0.0  ;;  %v1318_v31 = vld [vmem:[%s2070_s2 + $0x80] sm:$0xff]  ;;  %v1319_v32 = vld [vmem:[%s2070_s2 + $0x88] sm:$0xff]  ;;  %v1321_v35 = vld [vmem:[%s2070_s2 + $0x98] sm:$0xff] }
 0x18c   : > { %v567_v50 = vmax.f32 %v565_v34, %v566_v43  ;;  %v573_v51 = vrot.slane %v572_v44, 2  ;;  %v581_v52 = vmax.f32 %v579_v36, %v580_v45  ;;  %v587_v53 = vrot.slane %v586_v46, 2  ;;  %v1320_v34 = vld [vmem:[%s2070_s2 + $0x90] sm:$0xff]  ;;  %v1322_v38 = vld [vmem:[%s2070_s2 + $0xa0] sm:$0xff]  ;;  %v1323_v39 = vld [vmem:[%s2070_s2 + $0xa8] sm:$0xff] }
 0x18d   : > { %v562_v54 = vmax.f32 %v560_v42, %v561_v49  ;;  %v592_v57 = vmax.f32 %v548_v47, 0.0  ;;  %v593_v58 = vmax.f32 %v555_v48, 0.0  ;;  %v1635_v20 = vpack.c.bf16 %v626_v19, %v625_v18  ;;  %v1324_v42 = vld [vmem:[%s2070_s2 + $0xb0] sm:$0xff]  ;;  %v1325_v43 = vld [vmem:[%s2070_s2 + $0xb8] sm:$0xff]  ;;  %v943_v48 = vld [vmem:[%s2071_s3] sm:$0xff] }
 0x18e   : > { %v568_v59 = vrot.slane %v567_v50, 1  ;;  %v574_v60 = vmax.f32 %v572_v44, %v573_v51  ;;  %v582_v61 = vrot.slane %v581_v52, 1  ;;  %v588_v62 = vmax.f32 %v586_v46, %v587_v53  ;;  %v944_v49 = vld [vmem:[%s2071_s3 + $0x8] sm:$0xff]  ;;  %v1327_v51 = vld [vmem:[%s2071_s3 + $0x40] sm:$0xff] }
 0x18f   : > { %v594_v63 = vmax.f32 %v562_v54, 0.0  ;;  %v608_v0 = vsel %vm607_vm5, %v592_v57, %v591_v55  ;;  %v1638_v24 = vpack.c.bf16 %v628_v22, %v627_v21  ;;  %v1641_v27 = vpack.c.bf16 %v630_v26, %v629_v25  ;;  %v945_v54 = vld [vmem:[%s2071_s3 + $0x10] sm:$0xff]  ;;  %v946_v55 = vld [vmem:[%s2071_s3 + $0x18] sm:$0xff] }
 0x190   : > { %v610_v1 = vsel %vm609_vm6, %v593_v58, %v608_v0  ;;  %v569_v2 = vmax.f32 %v567_v50, %v568_v59  ;;  %v575_v3 = vrot.slane %v574_v60, 1  ;;  %v583_v4 = vmax.f32 %v581_v52, %v582_v61  ;;  %v1328_v52 = vld [vmem:[%s2071_s3 + $0x48] sm:$0xff]  ;;  %v1329_v58 = vld [vmem:[%s2071_s3 + $0x50] sm:$0xff]  ;;  %v1330_v59 = vld [vmem:[%s2071_s3 + $0x58] sm:$0xff] }
 0x191   : > { %v612_v5 = vsel %vm611_vm7, %v594_v63, %v610_v1  ;;  %v589_v6 = vrot.slane %v588_v62, 1  ;;  %v1644_v30 = vpack.c.bf16 %v632_v29, %v631_v28  ;;  %v1647_v33 = vpack.c.bf16 %v1319_v32, %v1318_v31  ;;  %v947_v61 = vld [vmem:[%s2071_s3 + $0x20] sm:$0xff]  ;;  %v1332_v1 = vld [vmem:[%s2071_s3 + $0x68] sm:$0xff] }
 0x192   : > { %v576_v7 = vmax.f32 %v574_v60, %v575_v3  ;;  %v595_v9 = vmax.f32 %v569_v2, 0.0  ;;  %v597_v11 = vmax.f32 %v583_v4, 0.0  ;;  %v1650_v37 = vpack.c.bf16 %v1321_v35, %v1320_v34  ;;  %v1331_v0 = vld [vmem:[%s2071_s3 + $0x60] sm:$0xff]  ;;  %v949_v3 = vld [vmem:[%s2071_s3 + $0x30] sm:$0xff]  ;;  %v950_v4 = vld [vmem:[%s2071_s3 + $0x38] sm:$0xff] }
 0x193   : > { %v590_v10 = vmax.f32 %v588_v62, %v589_v6  ;;  %v1653_v40 = vpack.c.bf16 %v1323_v39, %v1322_v38  ;;  %v1656_v44 = vpack.c.bf16 %v1325_v43, %v1324_v42  ;;  %v1671_v50 = vpack.c.bf16 %v944_v49, %v943_v48  ;;  %v948_v62 = vld [vmem:[%s2071_s3 + $0x28] sm:$0xff] }
 0x194   : > { %v596_v12 = vmax.f32 %v576_v7, 0.0  ;;  %v614_v13 = vsel %vm613_vm8, %v595_v9, %v612_v5  ;;  %v1659_v53 = vpack.c.bf16 %v1328_v52, %v1327_v51  ;;  %v1674_v57 = vpack.c.bf16 %v946_v55, %v945_v54  ;;  %v1333_v5 = vld [vmem:[%s2071_s3 + $0x70] sm:$0xff]  ;;  %v1334_v7 = vld [vmem:[%s2071_s3 + $0x78] sm:$0xff]  ;;  %v1338_v54 = vld [vmem:[%s2071_s3 + $0x88] sm:$0xff] }
 0x195   : > { %v598_v14 = vmax.f32 %v590_v10, 0.0  ;;  %1672 = vmatpush3.bf16.msra.mxu0 %v1671_v50  ;;  %v1662_v60 = vpack.c.bf16 %v1330_v59, %v1329_v58  ;;  %v1677_v63 = vpack.c.bf16 %v948_v62, %v947_v61  ;;  %v1665_v2 = vpack.c.bf16 %v1332_v1, %v1331_v0  ;;  %v1340_v58 = vld [vmem:[%s2071_s3 + $0x98] sm:$0xff]  ;;  %v1341_v62 = vld [vmem:[%s2071_s3 + $0xa0] sm:$0xff]  ;;  %v1343_v1 = vld [vmem:[%s2071_s3 + $0xb0] sm:$0xff] }
 0x196   : > { %v616_v15 = vsel %vm615_vm9, %v596_v12, %v614_v13  ;;  %1673 = vmatprep.subr.bf16.mxu0 %v1729_v41  ;;  %v1680_v6 = vpack.c.bf16 %v950_v4, %v949_v3  ;;  %v1668_v9 = vpack.c.bf16 %v1334_v7, %v1333_v5 }
 0x197   : > { %v618_v16 = vsel %vm617_vm10, %v597_v11, %v616_v15 }
 0x198   : > { %v620_v17 = vsel %vm619_vm11, %v598_v14, %v618_v16 }
 0x199   : > { %623 = vst.msk [vmem:[#allocation3 + $0x1] sm:$0xff] %vm622_vm12, %v620_v17  ;;  %1675 = vmatpush3.bf16.msra.mxu0 %v1674_v57  ;;  %v1339_v57 = vld [vmem:[%s2071_s3 + $0x90] sm:$0xff] }
 0x19a   : > { %1676 = vmatprep.subr.bf16.mxu0 %v1729_v41  ;;  %v1686_v61 = vpack.c.bf16 %v1340_v58, %v1339_v57 }
 0x19d   : > { %1678 = vmatpush3.bf16.msra.mxu0 %v1677_v63  ;;  %v1342_v63 = vld [vmem:[%s2071_s3 + $0xa8] sm:$0xff] }
 0x19e   : > { %1679 = vmatprep.subr.bf16.mxu0 %v1729_v41  ;;  %v1689_v0 = vpack.c.bf16 %v1342_v63, %v1341_v62 }
 0x1a0   : > { %v633_v23 = vld [vmem:[#allocation3 + $0x1] sm:$0xff] }
 0x1a1   : > { %1489 = vmatmul.mubr.msk.f32.vlgmr.msra.gmra.mrb[0].mxu1 %vm622_vm12, %v633_v23  ;;  %v624_v36 = vld [vmem:[#allocation3] sm:$0xff]  ;;  %1681 = vmatpush3.bf16.msra.mxu0 %v1680_v6 }
 0x1a2   : > { %1636 = vmatpush3.bf16.msra.mxu1 %v1635_v20  ;;  %1507 = vmatprep.mubr.msk.f32.mxu1 %vm1730_vm2, %v1727_v8  ;;  %v789_v45 = vld [vmem:[#allocation3 + $0x2] sm:$0xff] }
 0x1a3   : > { %1637 = vmatprep.subr.bf16.mxu1 %v1729_v41  ;;  %1682 = vmatprep.subr.bf16.mxu0 %v1729_v41 }
 0x1a6   : > { %1639 = vmatpush3.bf16.msra.mxu1 %v1638_v24 }
 0x1a7   : > { %1640 = vmatprep.subr.bf16.mxu1 %v1729_v41 }
 0x1aa   : > { %1642 = vmatpush3.bf16.msra.mxu1 %v1641_v27 }
 0x1ab   : > { %1643 = vmatprep.subr.bf16.mxu1 %v1729_v41 }
 0x1ae   : > { %1645 = vmatpush3.bf16.msra.mxu1 %v1644_v30 }
 0x1af   : > { %1646 = vmatprep.subr.bf16.mxu1 %v1729_v41 }
 0x1b1   : > { %1508 = vmatmul.mubr.msk.f32.vlgmr.msra.gmra.mrb[0].mxu1 %vm622_vm12, %v624_v36 }
 0x1b2   : > { %1648 = vmatpush3.bf16.msra.mxu1 %v1647_v33  ;;  %1526 = vmatprep.mubr.msk.f32.mxu1 %vm1730_vm2, %v1727_v8 }
 0x1b3   : > { %1649 = vmatprep.subr.bf16.mxu1 %v1729_v41 }
 0x1b6   : > { %1651 = vmatpush3.bf16.msra.mxu1 %v1650_v37 }
 0x1b7   : > { %1652 = vmatprep.subr.bf16.mxu1 %v1729_v41 }
 0x1ba   : > { %1654 = vmatpush3.bf16.msra.mxu1 %v1653_v40 }
 0x1bb   : > { %1655 = vmatprep.subr.bf16.mxu1 %v1729_v41 }
 0x1be   : > { %1657 = vmatpush3.bf16.msra.mxu1 %v1656_v44 }
 0x1bf   : > { %1658 = vmatprep.subr.bf16.mxu1 %v1729_v41 }
 0x1c1   : > { %1527 = vmatmul.mubr.msk.f32.vlgmr.msra.gmra.mrb[0].mxu1 %vm622_vm12, %v789_v45 }
 0x1c2   : > { %1545 = vmatprep.mubr.msk.f32.mxu1 %vm1730_vm2, %v1727_v8  ;;  %1660 = vmatpush3.bf16.msra.mxu1 %v1659_v53  ;;  %v1337_v53 = vld [vmem:[%s2071_s3 + $0x80] sm:$0xff] }
 0x1c3   : > { %1661 = vmatprep.subr.bf16.mxu1 %v1729_v41  ;;  %v1683_v55 = vpack.c.bf16 %v1338_v54, %v1337_v53 }
 0x1c6   : > { %1663 = vmatpush3.bf16.msra.mxu1 %v1662_v60 }
 0x1c7   : > { %1664 = vmatprep.subr.bf16.mxu1 %v1729_v41 }
 0x1ca   : > { %1666 = vmatpush3.bf16.msra.mxu1 %v1665_v2 }
 0x1cb   : > { %1667 = vmatprep.subr.bf16.mxu1 %v1729_v41 }
 0x1ce   : > { %1669 = vmatpush3.bf16.msra.mxu1 %v1668_v9 }
 0x294   : > { %v868_v46 = vpop.f32.mrb[0].mxu1 }
 0x295   : > { %874 = vrot.lane.b32.xlu1 %v868_v46, %s1728_s7  ;;  %v1528_v47 = vpop.f32.mrb[1].mxu1 }
 0x307   : > { %v875_v10 = vpop.permute.xlu1 %874 }
 0x308   : > { %v877_v11 = vmax.f32 %v868_v46, %v875_v10 }
 0x30a   : > { %v879_v12 = vcombine.high %v877_v11, %v877_v11  ;;  %v886_v13 = vrot.slane %v877_v11, %v1876_v56 }
 0x30c   : > { %v893_v14 = vrot.slane %v879_v12, %v1876_v56  ;;  %v894_v15 = vcombine.high %v886_v13, %v886_v13  ;;  %v900_v16 = vsel %vm534_vm4, %v886_v13, -inf }
 0x30d   : > { %v901_v17 = vrot.slane %v900_v16, 4 }
 0x30e   : > { %v895_v18 = vcombine.high %v893_v14, %v893_v14  ;;  %v907_v19 = vsel %vm534_vm4, %v894_v15, -inf  ;;  %v914_v20 = vsel %vm534_vm4, %v893_v14, -inf }
 0x30f   : > { %v902_v21 = vmax.f32 %v900_v16, %v901_v17  ;;  %v908_v22 = vrot.slane %v907_v19, 4  ;;  %v915_v23 = vrot.slane %v914_v20, 4 }
 0x310   : > { %v921_v24 = vsel %vm534_vm4, %v895_v18, -inf }
 0x311   : > { %v903_v25 = vrot.slane %v902_v21, 2  ;;  %v909_v26 = vmax.f32 %v907_v19, %v908_v22  ;;  %v916_v27 = vmax.f32 %v914_v20, %v915_v23  ;;  %v922_v28 = vrot.slane %v921_v24, 4 }
 0x313   : > { %v904_v29 = vmax.f32 %v902_v21, %v903_v25  ;;  %v910_v30 = vrot.slane %v909_v26, 2  ;;  %v917_v31 = vrot.slane %v916_v27, 2  ;;  %v923_v32 = vmax.f32 %v921_v24, %v922_v28 }
 0x315   : > { %v905_v33 = vrot.slane %v904_v29, 1  ;;  %v911_v34 = vmax.f32 %v909_v26, %v910_v30  ;;  %v918_v35 = vmax.f32 %v916_v27, %v917_v31  ;;  %v924_v36 = vrot.slane %v923_v32, 2 }
 0x317   : > { %v906_v37 = vmax.f32 %v904_v29, %v905_v33  ;;  %v912_v38 = vrot.slane %v911_v34, 1  ;;  %v919_v39 = vrot.slane %v918_v35, 1  ;;  %v925_v40 = vmax.f32 %v923_v32, %v924_v36 }
 0x319   : > { %v913_v42 = vmax.f32 %v911_v34, %v912_v38  ;;  %v920_v43 = vmax.f32 %v918_v35, %v919_v39  ;;  %v926_v44 = vrot.slane %v925_v40, 1  ;;  %v928_v46 = vmax.f32 %v906_v37, 0.0 }
 0x31b   : > { %v927_v45 = vmax.f32 %v925_v40, %v926_v44  ;;  %v929_v47 = vmax.f32 %v913_v42, 0.0  ;;  %v930_v48 = vmax.f32 %v920_v43, 0.0 }
 0x31d   : > { %v931_v49 = vmax.f32 %v927_v45, 0.0  ;;  %v936_v50 = vsel %vm607_vm5, %v929_v47, %v928_v46 }
 0x31e   : > { %v937_v51 = vsel %vm609_vm6, %v930_v48, %v936_v50 }
 0x31f   : > { %v938_v52 = vsel %vm611_vm7, %v931_v49, %v937_v51 }
 0x320   : > { %941 = vst.msk [vmem:[#allocation4 + $0x1] sm:$0xf] %vm940_vm13, %v938_v52 }
 0x327   : > { %v951_v59 = vld [vmem:[#allocation4 + $0x1] sm:$0xf] }
 0x328   : > { %v942_v60 = vld [vmem:[#allocation4] sm:$0xf]  ;;  %1546 = vmatmul.mubr.msk.f32.vlgmr.msra.gmra.mrb[2].mxu1 %vm622_vm12, %v951_v59 }
 0x329   : > { %1565 = vmatmul.mubr.msk.f32.vlgmr.msra.gmra.mrb[2].mxu0 %vm622_vm12, %v942_v60  ;;  %v1107_v3 = vld [vmem:[#allocation4 + $0x2] sm:$0xf] }
 0x32a   : > { %1684 = vmatpush3.bf16.msra.mxu0 %v1683_v55  ;;  %1583 = vmatprep.mubr.msk.f32.mxu0 %vm1730_vm2, %v1727_v8  ;;  %v1344_v8 = vld [vmem:[%s2071_s3 + $0xb8] sm:$0xff] }
 0x32b   : > { %1685 = vmatprep.subr.bf16.mxu0 %v1729_v41  ;;  %v1692_v2 = vpack.c.bf16 %v1344_v8, %v1343_v1 }
 0x32e   : > { %1687 = vmatpush3.bf16.msra.mxu0 %v1686_v61 }
 0x32f   : > { %1688 = vmatprep.subr.bf16.mxu0 %v1729_v41 }
 0x332   : > { %1690 = vmatpush3.bf16.msra.mxu0 %v1689_v0 }
 0x333   : > { %1691 = vmatprep.subr.bf16.mxu0 %v1729_v41 }
 0x336   : > { %1693 = vmatpush3.bf16.msra.mxu0 %v1692_v2 }
 0x339   : > { %1584 = vmatmul.mubr.msk.f32.vlgmr.msra.gmra.mrb[2].mxu0 %vm622_vm12, %v1107_v3 }
 0x3fb   : > { %v1030_v4 = vpop.f32.mrb[2].mxu1 }
 0x3fc   : > { %v1547_v5 = vpop.f32.mrb[3].mxu1 }
 0x40c   : > { %v1186_v6 = vpop.f32.mrb[2].mxu0 }
 0x40d   : > { %v1694_v7 = vadd.f32 %v1186_v6, %v1030_v4  ;;  %v1585_v9 = vpop.f32.mrb[3].mxu0 }
 0x40f   : > { %1192 = vrot.lane.b32.xlu1 %v1694_v7, %s1732_s10 }
 0x481   : > { %v1193_v10 = vpop.permute.xlu1 %1192 }
 0x482   : > { %v1195_v11 = vmax.f32 %v1694_v7, %v1193_v10 }
 0x484   : > { %v1203_v12 = vrot.slane %v1195_v11, %v1876_v56 }
 0x486   : > { %v1204_v13 = vcombine.high %v1203_v12, %v1203_v12  ;;  %v1208_v41 = vsel %vm1207_vm14, %v1203_v12, -inf }
 0x487   : > { %v1209_v14 = vrot.slane %v1208_v41, 4 }
 0x488   : > { %v1215_v15 = vsel %vm1207_vm14, %v1204_v13, -inf }
 0x489   : > { %v1210_v16 = vmax.f32 %v1208_v41, %v1209_v14  ;;  %v1216_v17 = vrot.slane %v1215_v15, 4 }
 0x48b   : > { %v1211_v18 = vrot.slane %v1210_v16, 2  ;;  %v1217_v19 = vmax.f32 %v1215_v15, %v1216_v17 }
 0x48d   : > { %v1212_v20 = vmax.f32 %v1210_v16, %v1211_v18  ;;  %v1218_v21 = vrot.slane %v1217_v19, 2 }
 0x48f   : > { %v1213_v22 = vrot.slane %v1212_v20, 1  ;;  %v1219_v23 = vmax.f32 %v1217_v19, %v1218_v21 }
 0x491   : > { %v1214_v24 = vmax.f32 %v1212_v20, %v1213_v22  ;;  %v1220_v25 = vrot.slane %v1219_v23, 1 }
 0x493   : > { %v1221_v26 = vmax.f32 %v1219_v23, %v1220_v25  ;;  %v1222_v56 = vmax.f32 %v1214_v24, 0.0 }
 0x495   : > { %v1223_v27 = vmax.f32 %v1221_v26, 0.0 }
 0x497   : > { %v1226_v28 = vsel %vm607_vm5, %v1223_v27, %v1222_v56 }
 0x498   : > { %1228 = vst.msk [vmem:[%s195_s14] sm:$0x3] %vm1207_vm14, %v1226_v28 }
 0x499 PF: > { %s14_s15 = sadd.s32 1, %s1725_s15  }
 0x49a   : > { %p11_p4 = scmp.ge.s32.totalorder %s14_s15, 4  }
 0x49c   :  { %13 = sbr.rel (!%p11_p4) target bundleno = 1 (0x1), region = 72 }

</bundles_post_ra>
